<compile_context>
chip_gen: v7x
topology: tpu7x:2x2x1
jax: 0.10.0
libtpu: 0.0.40
codegen_flags: <defaults>
</compile_context>

<pallas_src>
import jax
import jax.numpy as jnp
from jax.experimental import pallas as pl
from jax.experimental.pallas import tpu as pltpu

_LANE = 128
_SUBLANE = 8
# Double-buffered per-step working-set budget; safe on every generation
# (v7x: 64 MiB physical VMEM).  vmem limit leaves headroom above the budget.
_VMEM_WORKING_SET_BUDGET = 40 * 1024 * 1024
_VMEM_LIMIT_BYTES = 56 * 1024 * 1024


def _round_up(n, m):
    return (n + m - 1) // m * m


# ---------------------------------------------------------------------------
# Kernels
# ---------------------------------------------------------------------------
def _tmp_add_kernel(x_ref, k_ref, o_ref):
    # x_ref: (1, Tp, Ts)   k_ref: (Tp, F, 1)   o_ref: (1, Tp, F, Ts)
    x = x_ref[...].astype(o_ref.dtype)          # (1, Tp, Ts)
    k = k_ref[...].astype(o_ref.dtype)          # (Tp, F, 1) -> lane broadcast
    o_ref[...] = x[:, :, None, :] + k[None, :, :, :]


def _tmp_add_kernel_flat(x_ref, k_ref, o_ref):
    # Lane-dense path for small / non-128-multiple spatial sizes.
    # x_ref: (1, Tp, S)   k_ref: (Tp, F, 1)   o_ref: (1, Tp, F*S)
    tp, f, _ = k_ref.shape
    s = x_ref.shape[-1]
    x = x_ref[...].astype(o_ref.dtype)
    k = k_ref[...].astype(o_ref.dtype)
    y = x[:, :, None, :] + k[None, :, :, :]     # (1, Tp, F, S)
    o_ref[...] = y.reshape(1, tp, f * s)


# ---------------------------------------------------------------------------
# Budget-aware tile selection
# ---------------------------------------------------------------------------
def _block_bytes_lane_dense(tp, ts, F, x_item, k_item, o_item):
    """Double-buffered VMEM working set of one lane-dense grid step."""
    x_blk = _round_up(tp, _SUBLANE) * _round_up(ts, _LANE) * x_item
    k_blk = tp * _round_up(F, _SUBLANE) * _LANE * k_item          # (tp, F, 1) lane-padded
    o_blk = tp * _round_up(F, _SUBLANE) * _round_up(ts, _LANE) * o_item
    return 2 * (x_blk + k_blk + o_blk)


def _pick_tiles_lane_dense(S, P, F, x_item, k_item, o_item):
    """Largest (tile_p, tile_s) whose working set fits the VMEM budget."""
    tile_p, tile_s = P, S
    # Shrink the lane tile first (keeps whole P resident), then tile P.
    while tile_s > _LANE and _block_bytes_lane_dense(
            tile_p, tile_s, F, x_item, k_item, o_item) > _VMEM_WORKING_SET_BUDGET:
        tile_s = max(_LANE, _round_up(tile_s // 2, _LANE))
    while tile_p > _SUBLANE and _block_bytes_lane_dense(
            tile_p, tile_s, F, x_item, k_item, o_item) > _VMEM_WORKING_SET_BUDGET:
        tile_p = _round_up(max(_SUBLANE, tile_p // 2), _SUBLANE)
    return tile_p, tile_s


def _block_bytes_flat(tp, S, F, x_item, k_item, o_item):
    x_blk = _round_up(tp, _SUBLANE) * _round_up(S, _LANE) * x_item
    k_blk = tp * _round_up(F, _SUBLANE) * _LANE * k_item
    o_blk = _round_up(tp, _SUBLANE) * _round_up(F * S, _LANE) * o_item
    tmp = tp * _round_up(F, _SUBLANE) * _round_up(S, _LANE) * o_item  # in-kernel (Tp,F,S)
    return 2 * (x_blk + k_blk + o_blk) + tmp


def _pick_tile_p_flat(S, P, F, x_item, k_item, o_item):
    tp = P
    while tp > _SUBLANE and _block_bytes_flat(
            tp, S, F, x_item, k_item, o_item) > _VMEM_WORKING_SET_BUDGET:
        tp = _round_up(max(_SUBLANE, tp // 2), _SUBLANE)
    return tp


# ---------------------------------------------------------------------------
# Forward wrapper
# ---------------------------------------------------------------------------
def tmp_add_forward(x, k):
    """x: (B, C, H, W) with C == kh*kw*in_channels.  k: (kh, kw, cin, F).
    Returns (B, C, F, H, W), matching PyTorch TMP_Add.forward."""
    B, C, H, W = x.shape
    kh, kw, cin, F = k.shape
    P = kh * kw * cin
    assert C == P, "TMP_Add broadcast requires x channels == kh*kw*in_channels"
    S = H * W

    out_dtype = jnp.promote_types(x.dtype, k.dtype)   # match torch promotion
    x_item = jnp.dtype(x.dtype).itemsize
    k_item = jnp.dtype(k.dtype).itemsize
    o_item = jnp.dtype(out_dtype).itemsize

    x3d = x.reshape(B, P, S)        # contiguous view, no HBM transpose
    k3d = k.reshape(P, F, 1)        # lane-0 broadcast layout for the kernel

    cost = pl.CostEstimate(
        flops=B * P * F * S,
        transcendentals=0,
        bytes_accessed=B * P * S * x_item + P * F * k_item + B * P * F * S * o_item)

    lane_dense = (S % _LANE == 0) and (S >= _LANE)

    if lane_dense:
        tile_p, tile_s = _pick_tiles_lane_dense(S, P, F, x_item, k_item, o_item)
        num_p = pl.cdiv(P, tile_p)
        num_s = pl.cdiv(S, tile_s)
        # v7x megacore: make sure both TensorCores get at least one step.
        if B * num_p * num_s < 2 and tile_s >= 2 * _LANE:
            tile_s = max(_LANE, _round_up(tile_s // 2, _LANE))
            num_s = pl.cdiv(S, tile_s)

        out = pl.pallas_call(
            _tmp_add_kernel,
            out_shape=jax.ShapeDtypeStruct((B, P, F, S), out_dtype),
            grid_spec=pltpu.PrefetchScalarGridSpec(
                num_scalar_prefetch=0,
                grid=(B, num_p, num_s),
                in_specs=[
                    pl.BlockSpec((1, tile_p, tile_s), lambda b, p, s: (b, p, s)),
                    pl.BlockSpec((tile_p, F, 1), lambda b, p, s: (p, 0, 0)),
                ],
                out_specs=pl.BlockSpec((1, tile_p, F, tile_s),
                                       lambda b, p, s: (b, p, 0, s)),
            ),
            compiler_params=pltpu.CompilerParams(
                dimension_semantics=("parallel", "parallel", "parallel"),
                vmem_limit_bytes=_VMEM_LIMIT_BYTES),
            cost_estimate=cost,
        )(x3d, k3d)
        return out.reshape(B, P, F, H, W)

    # Small / ragged spatial path: lane axis is F*S (contiguous slice of the
    # row-major (B, P, F, H, W) output) -> wide, unmasked stores.
    tile_p = _pick_tile_p_flat(S, P, F, x_item, k_item, o_item)
    num_p = pl.cdiv(P, tile_p)
    out = pl.pallas_call(
        _tmp_add_kernel_flat,
        out_shape=jax.ShapeDtypeStruct((B, P, F * S), out_dtype),
        grid_spec=pltpu.PrefetchScalarGridSpec(
            num_scalar_prefetch=0,
            grid=(B, num_p),
            in_specs=[
                pl.BlockSpec((1, tile_p, S), lambda b, p: (b, p, 0)),
                pl.BlockSpec((tile_p, F, 1), lambda b, p: (p, 0, 0)),
            ],
            out_specs=pl.BlockSpec((1, tile_p, F * S), lambda b, p: (b, p, 0)),
        ),
        compiler_params=pltpu.CompilerParams(
            dimension_semantics=("parallel", "parallel"),
            vmem_limit_bytes=_VMEM_LIMIT_BYTES),
        cost_estimate=cost,
    )(x3d, k3d)
    return out.reshape(B, P, F, H, W)


def _reference_forward(x, k):
    """Pure-JAX mirror of the PyTorch TMP_Add forward (for validation)."""
    kh, kw, cin, F = k.shape
    P = kh * kw * cin
    kp = k.reshape(P, F)
    return x[:, :, None, :, :] + kp[None, :, :, None, None]   # (B, P, F, H, W)


if __name__ == "__main__":
    # Small shapes consistent with the module: kernel_size=(1,1),
    # input_shape=(4, 16, 16), filters=8  =>  P = 1*1*4 = 4 == x channels.
    B, H, W = 2, 16, 16
    kh, kw, cin, filters = 1, 1, 4, 8

    key = jax.random.PRNGKey(0)
    kx, kk = jax.random.split(key)

    x = jax.random.normal(kx, (B, cin * kh * kw, H, W), dtype=jnp.float32)

    # Deterministic xavier_uniform-style init for the TMP_Add kernel parameter.
    fan_in, fan_out = kh * kw * cin, filters
    bound = (6.0 / (fan_in + fan_out)) ** 0.5
    k = jax.random.uniform(kk, (kh, kw, cin, filters), jnp.float32, -bound, bound)

    y = tmp_add_forward(x, k)
    y = jax.block_until_ready(y)

    y_ref = _reference_forward(x, k)
    assert y.shape == (B, kh * kw * cin, filters, H, W)
    assert y.dtype == y_ref.dtype
    assert jnp.allclose(y, y_ref, rtol=1e-6, atol=1e-6), "mismatch vs JAX reference"

    # Also exercise the small/ragged-spatial (flat, lane-dense) path.
    x_small = jax.random.normal(kx, (B, cin, 5, 7), dtype=jnp.float32)
    y_small = jax.block_until_ready(tmp_add_forward(x_small, k))
    assert jnp.allclose(y_small, _reference_forward(x_small, k), rtol=1e-6, atol=1e-6)

    print("KERNEL_OK")
</pallas_src>

<mosaic_0001>
module attributes {stable_mosaic.version = 11 : i64} {
  func.func @_tmp_add_kernel(%arg0: i32, %arg1: i32, %arg2: i32, %arg3: memref<1x4x256xf32, #tpu.memory_space<vmem>>, %arg4: memref<4x8x1xf32, #tpu.memory_space<vmem>>, %arg5: memref<1x4x8x256xf32, #tpu.memory_space<vmem>>) attributes {dimension_semantics = [#tpu.dimension_semantics<parallel>, #tpu.dimension_semantics<parallel>, #tpu.dimension_semantics<parallel>], iteration_bounds = array<i64: 2, 1, 1>, scalar_prefetch = 0 : i64, scratch_operands = 0 : i64, tpu.core_type = #tpu.core_type<tc>, window_params = [{transform_indices = @transform_0, window_bounds = array<i64: 1, 4, 256>}, {transform_indices = @transform_1, window_bounds = array<i64: 4, 8, 1>}, {transform_indices = @transform_2, window_bounds = array<i64: 1, 4, 8, 256>}]} {
    %c0 = arith.constant 0 : index
    %c0_0 = arith.constant 0 : index
    %c0_1 = arith.constant 0 : index
    %0 = vector.load %arg3[%c0, %c0_0, %c0_1] : memref<1x4x256xf32, #tpu.memory_space<vmem>>, vector<1x4x256xf32>
    %c0_2 = arith.constant 0 : index
    %c0_3 = arith.constant 0 : index
    %c0_4 = arith.constant 0 : index
    %1 = vector.load %arg4[%c0_2, %c0_3, %c0_4] : memref<4x8x1xf32, #tpu.memory_space<vmem>>, vector<4x8x1xf32>
    %2 = vector.shape_cast %0 : vector<1x4x256xf32> to vector<1x4x1x256xf32>
    %3 = vector.shape_cast %1 : vector<4x8x1xf32> to vector<1x4x8x1xf32>
    %4 = vector.broadcast %2 : vector<1x4x1x256xf32> to vector<1x4x8x256xf32>
    %5 = vector.broadcast %3 : vector<1x4x8x1xf32> to vector<1x4x8x256xf32>
    %6 = arith.addf %4, %5 : vector<1x4x8x256xf32>
    %c0_5 = arith.constant 0 : index
    %c0_6 = arith.constant 0 : index
    %c0_7 = arith.constant 0 : index
    %c0_8 = arith.constant 0 : index
    %7 = vector.load %arg5[%c0_5, %c0_6, %c0_7, %c0_8] : memref<1x4x8x256xf32, #tpu.memory_space<vmem>>, vector<1x4x8x256xf32>
    tpu.vector_store %arg5[%c0_5, %c0_6, %c0_7, %c0_8], %6 {strides = array<i32>} : memref<1x4x8x256xf32, #tpu.memory_space<vmem>>, vector<1x4x8x256xf32>,
    return
  }
  func.func @transform_0(%arg0: i32, %arg1: i32, %arg2: i32) -> (i32, i32, i32) {
    %c0_i32 = arith.constant 0 : i32
    return %arg0, %arg1, %arg2 : i32, i32, i32
  }
  func.func @transform_1(%arg0: i32, %arg1: i32, %arg2: i32) -> (i32, i32, i32) {
    %c0_i32 = arith.constant 0 : i32
    %c0_i32_0 = arith.constant 0 : i32
    %c0_i32_1 = arith.constant 0 : i32
    return %arg1, %c0_i32, %c0_i32_0 : i32, i32, i32
  }
  func.func @transform_2(%arg0: i32, %arg1: i32, %arg2: i32) -> (i32, i32, i32, i32) {
    %c0_i32 = arith.constant 0 : i32
    %c0_i32_0 = arith.constant 0 : i32
    return %arg0, %arg1, %c0_i32, %arg2 : i32, i32, i32, i32
  }
}

</mosaic_0001>

<bundles_post_ra>
// kernel: tpu_custom_call.1
= control target key start
LH: loop header
LB: loop body
LE: loop exit
PB: predicated region body
PF: predicated region fallthrough
CT: control target
= control target key end

     0   :  { %7 = vsyncpa [#allocation3], 0  ;;  %s758_s0 = inlined_call_operand.vmem [shape: f32[2,4,256], index: 0, kind: input, shape index: {}]   ;;  %s759_s1 = inlined_call_operand.vmem [shape: f32[4,8,1], index: 1, kind: input, shape index: {}]   ;;  %s760_s2 = inlined_call_operand.hbm [shape: f32[2,4,8,256], index: 2, kind: output, shape index: {}]  }
   0x1   :  { %9 = vsyncpa [#allocation3 + $0x1], 0  ;;  %s627_s9 = smov 0   ;;  %s629_s10 = smov 0  }
   0x2   :  { %s631_s11 = smov 0   ;;  %s633_s12 = smov 0  }
   0x3   :  { %s635_s13 = smov 0   ;;  %s637_s14 = smov 0  }
   0x4 LB: > { %s449_s15 = sadd.s32 4294967295, %s605_s14   ;;  %s450_s16 = sadd.s32 4294967294, %s605_s14   ;;  %s605_s14 = sphi %s637_s14, %s15_s14   ;;  %s601_s13 = sphi %s635_s13, %s767_s13   ;;  %s597_s12 = sphi %s633_s12, %s766_s12   ;;  %s593_s11 = sphi %s631_s11, %s765_s11   ;;  %s589_s10 = sphi %s629_s10, %s764_s10   ;;  %s585_s9 = sphi %s627_s9, %s763_s9  }
   0x5   : > { %s34_s17 = sadd.s32 1, %s601_s13  ;;  %s101_s18 = sadd.s32 1, %s593_s11 }
   0x6   : > { %p36_p0 = scmp.ge.s32.totalorder %s34_s17, 2  ;;  %p111_p1 = scmp.ne.s32.totalorder %s593_s11, %s589_s10 }
   0x7   : > { %p112_p2 = scmp.eq.s32.totalorder %s449_s15, 1  ;;  %p117_p3 = scmp.ne.s32.totalorder %s589_s10, %s585_s9 }
   0x8   : > { %s769_s17 = smov (%p36_p0, %s34_s17), 0  ;;  %p118_p5 = scmp.eq.s32.totalorder %s450_s16, 1 }
   0x9   : > { %p667_p4 = por %p112_p2, %p111_p1  ;;  %s94_s20 = ssub.s32 %s601_s13, %s769_s17 }
   0xa   : > { %p454_p6 = scmp.ge.s32.totalorder %s605_s14, 1  ;;  %p99_p7 = scmp.eq.s32.totalorder %s94_s20, 0 }
   0xb   : > { %p674_p8 = por %p118_p5, %p117_p3  ;;  %p162_p9 = scmp.lt.s32.totalorder %s605_s14, 3 }
   0xc   : > { %s680_s22 = scalar_select %p99_p7, %s593_s11, %s101_s18  }
   0xd   : > { %p163_p10 = pnand %p454_p6, %p162_p9 }
   0xe   : > { %v222_v0 = vld [vmem:[%s759_s1 + $0x10] sm:$0xff] (!%p163_p10)  ;;  %v220_v1 = vld [vmem:[%s759_s1] sm:$0xff] (!%p163_p10)  ;;  %v607_v2 = vmov (!%p163_p10), 0   ;;  %v223_v3 = vld [vmem:[%s759_s1 + $0x18] sm:$0xff] (!%p163_p10)  ;;  %p198_p11 = scmp.lt.s32.totalorder (!%p163_p10), %s597_s12, 1  ;;  %v236_v7 = vlaneseq (!%p163_p10)  ;;  %s194_s8 = sand.u32 (!%p163_p10), 1, %s589_s10  }
   0xf   : > { %166 = sbr.rel (%p163_p10) target bundleno = 166 (0xa6), region = 28  ;;  %526 = vset.pattern.permute.xlu1 (!%p163_p10), %v607_v2  ;;  %525 = vset.pattern.permute.xlu0 (!%p163_p10), %v607_v2  ;;  %v221_v4 = vld [vmem:[%s759_s1 + $0x8] sm:$0xff] (!%p163_p10)  ;;  %v608_v5 = vmov (!%p163_p10), 1966171168   ;;  %s455_s15 = sshll.u32 (!%p163_p10), %s194_s8, 6 }
  0x10   : > { %301 = vperm.xlu1 (!%p163_p10), %526, %v222_v0   ;;  %291 = vperm.xlu0 (!%p163_p10), %525, %v220_v1   ;;  %v234_v6 = vunpack.c.l.s4 (!%p163_p10), %v608_v5  ;;  %v237_v9 = vshrl.u32 (!%p163_p10), %v236_v7, 7  ;;  %s465_s16 = sshll.u32 (!%p163_p10), %s597_s12, 10  ;;  %s196_s18 = scalar_lea.vmem (!%p163_p10), [#allocation2], %s455_s15 }
  0x11   : > { %s344_s20 = sshll.u32 (!%p163_p10), %s196_s18, 4  ;;  %s706_s25 = scalar_lea.hbm (!%p163_p10), %s760_s2, %s465_s16  ;;  %s708_s20 = int_to_ptr.vmem [resolvable:$true] %s344_s20 }
  0x12   : > { %v235_v8 = vunpack.c.0.s8 (!%p163_p10), %v234_v6  ;;  %v251_v15 = vsub.s32 (!%p163_p10), 0, %v237_v9  ;;  %v255_v16 = vsub.s32 (!%p163_p10), 1, %v237_v9  ;;  %s527_s26 = scalar_lea.vmem (!%p163_p10), %s708_s20, 1024  ;;  %s609_s27 = smov (!%p163_p10), [#allocation2]  }
  0x13   : > { %p528_p12 = scmp.ne.s32.totalorder (!%p163_p10), %s708_s20, %s527_s26  ;;  %s531_s28 = sshll.u32 (!%p163_p10), %s609_s27, 4  ;;  %s532_s28 = int_to_ptr.vmem [resolvable:$false] %s531_s28 }
  0x14   : > { %306 = vperm.xlu1 (!%p163_p10), %526, %v223_v3   ;;  %296 = vperm.xlu0 (!%p163_p10), %525, %v221_v4   ;;  %v238_v10 = vsub.s32 (!%p163_p10), %v235_v8, %v237_v9  ;;  %s533_s29 = scalar_lea.vmem (!%p163_p10), %s532_s28, 2048  ;;  %p534_p1 = scmp.lt.s32.totalorder (!%p163_p10), %s708_s20, %s532_s28 }
  0x15   : > { %p529_p13 = pnand (!%p163_p10), %p528_p12, %p667_p4  ;;  %p535_p2 = scmp.lt.s32.totalorder (!%p163_p10), %s533_s29, %s527_s26 }
  0x16   : > { %s199_s3 = scalar_select %p198_p11, %s597_s12, 1 }
  0x17   : > { %s712_s12 = scalar_lea.sflag [#allocation3], %s194_s8  ;;  %p530_p0 = pneg %p529_p13 }
  0x18   : > { %s464_s4 = sshll.u32 %s199_s3, 3  ;;  %p536_p3 = por %p535_p2, %p534_p1 }
  0x19   : > { %s209_s7 = scalar_lea.vmem %s758_s0, %s464_s4 }
  0x1a   : > { %v458_v11 = vld.sshfl [vmem:[%s209_s7] sm:$0xff pattern:$0x75316420]  ;;  %p537_p5 = pnand %p536_p3, %p530_p0 }
  0x1b   : > { %v232_v12 = vcombine.high %v458_v11, %v458_v11  ;;  %v239_v13 = vrot.slane %v458_v11, %v238_v10 }
  0x1d   : > { %v246_v14 = vrot.slane %v232_v12, %v238_v10  ;;  %v247_v17 = vcombine.high %v239_v13, %v239_v13  ;;  %v252_v21 = vrot.slane %v239_v13, %v251_v15  ;;  %v256_v22 = vrot.slane %v239_v13, %v255_v16 }
  0x1f   : > { %v248_v18 = vcombine.high %v246_v14, %v246_v14  ;;  %v268_v19 = vrot.slane %v247_v17, %v251_v15  ;;  %v272_v20 = vrot.slane %v247_v17, %v255_v16  ;;  %v260_v27 = vrot.slane %v246_v14, %v251_v15 }
  0x20   : > { %v264_v28 = vrot.slane %v246_v14, %v255_v16 }
  0x21   : > { %v276_v25 = vrot.slane %v248_v18, %v251_v15  ;;  %v280_v26 = vrot.slane %v248_v18, %v255_v16 }
  0x8f   : > { %v302_v23 = vpop.permute.xlu1 %301  ;;  %v292_v24 = vpop.permute.xlu0 %291 }
  0x90   : > { %v313_v29 = vadd.f32 %v302_v23, %v268_v19  ;;  %v314_v30 = vadd.f32 %v302_v23, %v272_v20  ;;  %v309_v31 = vadd.f32 %v292_v24, %v252_v21  ;;  %v310_v32 = vadd.f32 %v292_v24, %v256_v22 }
  0x92   : > { %321 = vst [vmem:[%s196_s18 + $0x20] sm:$0xff] %v313_v29  ;;  %322 = vst [vmem:[%s196_s18 + $0x28] sm:$0xff] %v314_v30 }
  0x93   : > { %317 = vst [vmem:[%s196_s18] sm:$0xff] %v309_v31  ;;  %318 = vst [vmem:[%s196_s18 + $0x8] sm:$0xff] %v310_v32  ;;  %v307_v33 = vpop.permute.xlu1 %306  ;;  %v297_v34 = vpop.permute.xlu0 %296 }
  0x94   : > { %v315_v35 = vadd.f32 %v307_v33, %v276_v25  ;;  %v316_v36 = vadd.f32 %v307_v33, %v280_v26  ;;  %v311_v37 = vadd.f32 %v297_v34, %v260_v27  ;;  %v312_v38 = vadd.f32 %v297_v34, %v264_v28 }
  0x96   : > { %323 = vst [vmem:[%s196_s18 + $0x30] sm:$0xff] %v315_v35  ;;  %324 = vst [vmem:[%s196_s18 + $0x38] sm:$0xff] %v316_v36 }
  0x97   : > { %319 = vst [vmem:[%s196_s18 + $0x10] sm:$0xff] %v311_v37  ;;  %320 = vst [vmem:[%s196_s18 + $0x18] sm:$0xff] %v312_v38 }
  0x98   : > { %540 = shalt.err (!%p537_p5)
}
  0x99   : > { %s541_s30 = scalar_lea.hbm %s706_s25, 1024  ;;  %s545_s5 = scalar_lea.hbm %s760_s2, 2048 }
  0x9a   : > { %p542_p6 = scmp.ne.s32.totalorder %s706_s25, %s541_s30  ;;  %p546_p10 = scmp.lt.u32.totalorder %s706_s25, %s760_s2 }
  0x9b   : > { %p547_p11 = scmp.lt.u32.totalorder %s545_s5, %s541_s30  ;;  %p549_p13 = scmp.lt.u32.totalorder %s541_s30, %s706_s25 }
  0x9c   : > { %p543_p7 = pnand %p542_p6, %p667_p4 }
  0x9d   : > { %p548_p12 = por %p547_p11, %p546_p10 }
  0x9e   : > { %p544_p9 = pneg %p543_p7 }
  0x9f   : > { %p550_p0 = por %p549_p13, %p548_p12 }
  0xa1   : > { %p551_p1 = pnand %p550_p0, %p544_p9 }
  0xa3   : > { %554 = shalt.err (!%p551_p1)
}
  0xa4   : > { %s610_s8 = smov 256   ;;  %s611_s15 = smov 16  }
  0xa5   : > { %466 = dma.vmem_to_hbm [thread:$0]  (%p667_p4), %s708_s20, 1024, %s706_s25, %s712_s12, %s610_s8, %s610_s8, %s611_s15  }
  0xa6 PF: > { %p472_p2 = scmp.ge.s32.totalorder %s605_s14, 2  ;;  %s359_s16 = sand.u32 1, %s585_s9  }
  0xa7   : > { %s360_s18 = scalar_lea.sflag [#allocation3], %s359_s16 }
  0xa8   : > { %p469_p3 = pnand %p472_p2, %p674_p8 }
  0xaa   : > { %580 = dma.done.wait (!%p469_p3), %s360_s18, 1024  }
  0xab   : > { %582 = vsyncadd (!%p469_p3), %s360_s18, 4294966272  ;;  %s15_s14 = sadd.s32 1, %s605_s14   ;;  %s763_s9 = smov %s589_s10 }
  0xac   : > { %p12_p5 = scmp.ge.s32.totalorder %s15_s14, 4   ;;  %s764_s10 = smov %s593_s11 }
  0xad   : > { %s765_s11 = smov %s680_s22  ;;  %s766_s12 = smov %s601_s13 }
  0xae   : > { %s767_s13 = smov %s769_s17  ;;  %14 = sbr.rel (!%p12_p5) target bundleno = 4 (0x4), region = 66 }
  0xb5   :  { %365 = vsyncpa [#allocation3], 1 }
  0xb6   :  { %367 = vsyncpa [#allocation3 + $0x1], 1 }

</bundles_post_ra>
